<compile_context>
chip_gen: v7x
topology: tpu7x:2x2x1
jax: 0.10.0
libtpu: 0.0.40
codegen_flags: <defaults>
</compile_context>

<pallas_src>
import functools

import jax
import jax.numpy as jnp
from jax.experimental import pallas as pl
from jax.experimental.pallas import tpu as pltpu


def _dropout_kernel(seed_ref, x_ref, o_ref, *, threshold, scale):
    rows, cols = x_ref.shape

    # Global element index -> counter-based PRNG (tiling-independent mask).
    # NOTE: int32 counter; fine for activations < 2^31 elements.
    r = jax.lax.broadcasted_iota(jnp.int32, (rows, cols), 0)
    c = jax.lax.broadcasted_iota(jnp.int32, (rows, cols), 1)
    row0 = pl.program_id(0) * rows
    idx = (row0 + r) * cols + c

    # Mix in the seed (int32 wrap-around is fine for hashing), then bit-mix
    # with the murmur3 fmix32 finalizer in uint32.
    h = (idx + seed_ref[0] * jnp.int32(0x61C88647)).astype(jnp.uint32)
    h = h ^ (h >> 16)
    h = h * jnp.uint32(0x7FEB352D)
    h = h ^ (h >> 15)
    h = h * jnp.uint32(0x846CA68B)
    h = h ^ (h >> 16)

    keep = h >= jnp.uint32(threshold)          # P(keep) = 1 - drop_rate
    x = x_ref[...]
    scale_c = jnp.asarray(scale, dtype=x.dtype)  # stay in native dtype (bf16 ok)
    o_ref[...] = jnp.where(keep, x * scale_c, jnp.zeros_like(x))


def flatten_dropout(x, drop_rate, training, seed=0):
    """Pallas equivalent of FlattenDropout(drop_rate, training)(x)."""
    n = x.shape[0]
    x_flat = x.reshape(n, -1)                  # flatten: glue, no compute

    # F.dropout is a no-op when p == 0 or training is False.
    if drop_rate <= 0.0 or not training:
        return x_flat
    if drop_rate >= 1.0:
        return jnp.zeros_like(x_flat)

    feat = x_flat.shape[1]
    total = n * feat

    # Repack to a lane/sublane-dense slab: lane dim 512 (multiple of 128),
    # row tile 512 (multiple of 8) -> ~1 MiB f32 per block per buffer.
    COLS = 512
    ROW_TILE_MAX = 512
    rows = -(-total // COLS)                              # cdiv
    row_tile = min(ROW_TILE_MAX, -(-rows // 8) * 8)       # multiple of 8
    padded_rows = -(-rows // row_tile) * row_tile
    padded_total = padded_rows * COLS

    flat = x_flat.reshape(-1)
    if padded_total != total:
        flat = jnp.pad(flat, (0, padded_total - total))
    slab = flat.reshape(padded_rows, COLS)

    seed_arr = jnp.array([seed], dtype=jnp.int32)
    threshold = min(int(round(float(drop_rate) * (1 << 32))), (1 << 32) - 1)
    scale = 1.0 / (1.0 - float(drop_rate))

    kernel = functools.partial(_dropout_kernel, threshold=threshold, scale=scale)
    out_slab = pl.pallas_call(
        kernel,
        out_shape=jax.ShapeDtypeStruct((padded_rows, COLS), x_flat.dtype),
        grid=(padded_rows // row_tile,),
        in_specs=[
            pl.BlockSpec(memory_space=pltpu.MemorySpace.SMEM),   # seed scalar
            pl.BlockSpec((row_tile, COLS), lambda i: (i, 0)),
        ],
        out_specs=pl.BlockSpec((row_tile, COLS), lambda i: (i, 0)),
        compiler_params=pltpu.CompilerParams(
            dimension_semantics=("parallel",),   # split tiles across v7x's 2 TCs
        ),
    )(seed_arr, slab)

    return out_slab.reshape(-1)[:total].reshape(n, feat)


if __name__ == "__main__":
    # Small NCHW feature map, consistent with a ResNet head input.
    key = jax.random.PRNGKey(0)
    x = jax.random.normal(key, (2, 4, 16, 16), dtype=jnp.float32)

    drop_rate = 0.2
    training = True

    y = jax.block_until_ready(flatten_dropout(x, drop_rate, training, seed=0))

    # Sanity: flattened shape, dropped elems exactly zero, kept elems = x/(1-p).
    assert y.shape == (2, 4 * 16 * 16)
    x_flat = x.reshape(2, -1)
    kept = y != 0.0
    scale = 1.0 / (1.0 - drop_rate)
    assert jnp.allclose(jnp.where(kept, y, 0.0),
                        jnp.where(kept, x_flat * scale, 0.0),
                        rtol=1e-5, atol=1e-5)

    # Keep fraction should be roughly 1 - p.
    frac = float(jnp.mean(kept.astype(jnp.float32)))
    assert 0.65 < frac < 0.95, f"keep fraction {frac} out of expected range"

    # Eval-mode path is a pure flatten.
    y_eval = jax.block_until_ready(flatten_dropout(x, drop_rate, False))
    assert jnp.array_equal(y_eval, x_flat)

    print("KERNEL_OK")
</pallas_src>

<mosaic_0001>
module attributes {stable_mosaic.version = 11 : i64} {
  func.func @_dropout_kernel(%arg0: i32, %arg1: memref<1xi32, #tpu.memory_space<smem>>, %arg2: memref<8x512xf32, #tpu.memory_space<vmem>>, %arg3: memref<8x512xf32, #tpu.memory_space<vmem>>) attributes {dimension_semantics = [#tpu.dimension_semantics<parallel>], iteration_bounds = array<i64: 1>, scalar_prefetch = 0 : i64, scratch_operands = 0 : i64, tpu.core_type = #tpu.core_type<tc>, window_params = [{transform_indices = @transform_0, window_bounds = array<i64: 1>}, {transform_indices = @transform_1, window_bounds = array<i64: 8, 512>}, {transform_indices = @transform_2, window_bounds = array<i64: 8, 512>}]} {
    %0 = tpu.iota {dimensions = array<i32: 0>} : vector<8x512xi32>
    %1 = tpu.iota {dimensions = array<i32: 1>} : vector<8x512xi32>
    %c8_i32 = arith.constant 8 : i32
    %2 = arith.muli %arg0, %c8_i32 : i32
    %3 = vector.broadcast %2 : i32 to vector<8x512xi32>
    %4 = arith.addi %3, %0 : vector<8x512xi32>
    %c512_i32 = arith.constant 512 : i32
    %5 = vector.broadcast %c512_i32 : i32 to vector<8x512xi32>
    %6 = arith.muli %4, %5 : vector<8x512xi32>
    %7 = arith.addi %6, %1 : vector<8x512xi32>
    %c0 = arith.constant 0 : index
    %8 = memref.load %arg1[%c0] : memref<1xi32, #tpu.memory_space<smem>>
    %c1640531527_i32 = arith.constant 1640531527 : i32
    %9 = arith.muli %8, %c1640531527_i32 : i32
    %10 = vector.broadcast %9 : i32 to vector<8x512xi32>
    %11 = arith.addi %7, %10 : vector<8x512xi32>
    %c16_i32 = arith.constant 16 : i32
    %12 = vector.broadcast %c16_i32 : i32 to vector<8x512xi32>
    %13 = arith.shrui %11, %12 : vector<8x512xi32>
    %14 = arith.xori %11, %13 : vector<8x512xi32>
    %c2146121005_i32 = arith.constant 2146121005 : i32
    %15 = vector.broadcast %c2146121005_i32 : i32 to vector<8x512xi32>
    %16 = arith.muli %14, %15 : vector<8x512xi32>
    %c15_i32 = arith.constant 15 : i32
    %17 = vector.broadcast %c15_i32 : i32 to vector<8x512xi32>
    %18 = arith.shrui %16, %17 : vector<8x512xi32>
    %19 = arith.xori %16, %18 : vector<8x512xi32>
    %c-2073254261_i32 = arith.constant -2073254261 : i32
    %20 = vector.broadcast %c-2073254261_i32 : i32 to vector<8x512xi32>
    %21 = arith.muli %19, %20 : vector<8x512xi32>
    %c16_i32_0 = arith.constant 16 : i32
    %22 = vector.broadcast %c16_i32_0 : i32 to vector<8x512xi32>
    %23 = arith.shrui %21, %22 : vector<8x512xi32>
    %24 = arith.xori %21, %23 : vector<8x512xi32>
    %c858993459_i32 = arith.constant 858993459 : i32
    %25 = vector.broadcast %c858993459_i32 : i32 to vector<8x512xi32>
    %26 = arith.cmpi uge, %24, %25 : vector<8x512xi32>
    %c0_1 = arith.constant 0 : index
    %c0_2 = arith.constant 0 : index
    %27 = vector.load %arg2[%c0_1, %c0_2] : memref<8x512xf32, #tpu.memory_space<vmem>>, vector<8x512xf32>
    %cst = arith.constant 1.250000e+00 : f32
    %28 = vector.broadcast %cst : f32 to vector<8x512xf32>
    %29 = arith.mulf %27, %28 : vector<8x512xf32>
    %cst_3 = arith.constant 0.000000e+00 : f32
    %30 = vector.broadcast %cst_3 : f32 to vector<8x512xf32>
    %31 = arith.select %26, %29, %30 : vector<8x512xi1>, vector<8x512xf32>
    %c0_4 = arith.constant 0 : index
    %c0_5 = arith.constant 0 : index
    %32 = vector.load %arg3[%c0_4, %c0_5] : memref<8x512xf32, #tpu.memory_space<vmem>>, vector<8x512xf32>
    tpu.vector_store %arg3[%c0_4, %c0_5], %31 {strides = array<i32>} : memref<8x512xf32, #tpu.memory_space<vmem>>, vector<8x512xf32>,
    return
  }
  func.func @transform_0(%arg0: i32) -> i32 {
    %c0_i32 = arith.constant 0 : i32
    %c0_i32_0 = arith.constant 0 : i32
    return %c0_i32 : i32
  }
  func.func @transform_1(%arg0: i32) -> (i32, i32) {
    %c0_i32 = arith.constant 0 : i32
    %c0_i32_0 = arith.constant 0 : i32
    return %arg0, %c0_i32 : i32, i32
  }
  func.func @transform_2(%arg0: i32) -> (i32, i32) {
    %c0_i32 = arith.constant 0 : i32
    %c0_i32_0 = arith.constant 0 : i32
    return %arg0, %c0_i32 : i32, i32
  }
}

</mosaic_0001>

<bundles_post_ra>
// kernel: tpu_custom_call.1
= control target key start
LH: loop header
LB: loop body
LE: loop exit
PB: predicated region body
PF: predicated region fallthrough
CT: control target
= control target key end

     0   :  { %8 = vsyncpa [#allocation4], 0  ;;  %s208_s0 = inlined_call_operand.<no memory space> [shape: s32[1], index: 0, kind: input, shape index: {}]   ;;  %s209_s1 = inlined_call_operand.hbm [shape: f32[8,512], index: 1, kind: input, shape index: {}]   ;;  %s210_s2 = inlined_call_operand.hbm [shape: f32[8,512], index: 2, kind: output, shape index: {}]  }
   0x1   :  { %9 = vsyncpa [#allocation5], 0  ;;  %s164_s9 = smov [#allocation3]   ;;  %s116_s13 = scalar_lea.hbm %s209_s1, 512 }
   0x2   :  { %s18_s10 = sshll.u32 %s164_s9, 4  ;;  %p117_p0 = scmp.ne.s32.totalorder %s209_s1, %s116_s13  ;;  %s19_s10 = int_to_ptr.vmem [resolvable:$true] %s18_s10 }
   0x3   :  { %p120_p1 = scmp.lt.u32.totalorder %s116_s13, %s209_s1 }
   0x5   :  { %p122_p2 = pnand %p120_p1, %p117_p0 }
   0x7   :  { %125 = shalt.err (!%p122_p2)
}
   0x8   :  { %s126_s18 = scalar_lea.vmem %s19_s10, 512  ;;  %p131_p4 = scmp.lt.s32.totalorder %s19_s10, %s19_s10 }
   0x9   :  { %p127_p3 = scmp.ne.s32.totalorder %s19_s10, %s126_s18  ;;  %p132_p5 = scmp.lt.s32.totalorder %s126_s18, %s126_s18 }
   0xb   :  { %p133_p6 = por %p132_p5, %p131_p4 }
   0xd   :  { %p134_p7 = pnand %p133_p6, %p127_p3 }
   0xf   :  { %137 = shalt.err (!%p134_p7)
}
  0x10   :  { %21 = dma.hbm_to_vmem [thread:$0]  %s209_s1, 512, %s19_s10, [#allocation4]  }
  0x11   :  { %160 = dma.done.wait [#allocation4], 512  }
  0x12   :  { %161 = vsyncadd [#allocation4], 4294966784  ;;  %v25_v0 = vlaneseq  ;;  %s41_s23 = smul.u32 1640531527, %s208_s0  ;;  %v83_v37 = vld [vmem:[#allocation3] sm:$0xff]  ;;  %v84_v39 = vld [vmem:[#allocation3 + $0x8] sm:$0xff] }
  0x13   :  { %v85_v41 = vld [vmem:[#allocation3 + $0x10] sm:$0xff]  ;;  %v86_v43 = vld [vmem:[#allocation3 + $0x18] sm:$0xff]  ;;  %v87_v46 = vmul.f32 1.25, %v83_v37  ;;  %v88_v47 = vmul.f32 1.25, %v84_v39  ;;  %s165_s0 = smov [#allocation6]  }
  0x14   :  { %v26_v1 = vshrl.u32 %v25_v0, 7  ;;  %v28_v2 = vand.u32 127, %v25_v0  ;;  %v42_v7 = vstv %s41_s23  ;;  %v89_v52 = vmul.f32 1.25, %v85_v41  ;;  %s105_s1 = sshll.u32 %s165_s0, 4  ;;  %s106_s1 = int_to_ptr.vmem [resolvable:$true] %s105_s1 }
  0x15   :  { %v90_v53 = vmul.f32 1.25, %v86_v43  ;;  %s138_s24 = scalar_lea.vmem %s106_s1, 512  ;;  %p143_p9 = scmp.lt.s32.totalorder %s106_s1, %s106_s1 }
  0x16   :  { %v35_v3 = vmul.u32 512, %v26_v1  ;;  %v29_v4 = vadd.s32 128, %v28_v2  ;;  %v30_v5 = vadd.s32 256, %v28_v2  ;;  %v31_v6 = vadd.s32 384, %v28_v2  ;;  %p139_p8 = scmp.ne.s32.totalorder %s106_s1, %s138_s24  ;;  %p144_p10 = scmp.lt.s32.totalorder %s138_s24, %s138_s24 }
  0x18   :  { %v36_v8 = vadd.s32 %v35_v3, %v28_v2  ;;  %v37_v9 = vadd.s32 %v35_v3, %v29_v4  ;;  %v38_v10 = vadd.s32 %v35_v3, %v30_v5  ;;  %v39_v11 = vadd.s32 %v35_v3, %v31_v6  ;;  %p145_p11 = por %p144_p10, %p143_p9 }
  0x1a   :  { %v43_v12 = vadd.s32 %v42_v7, %v36_v8  ;;  %v44_v13 = vadd.s32 %v42_v7, %v37_v9  ;;  %v45_v14 = vadd.s32 %v42_v7, %v38_v10  ;;  %v46_v15 = vadd.s32 %v42_v7, %v39_v11  ;;  %p146_p12 = pnand %p145_p11, %p139_p8 }
  0x1c   :  { %v47_v16 = vshrl.u32 %v43_v12, 16  ;;  %v48_v17 = vshrl.u32 %v44_v13, 16  ;;  %v49_v18 = vshrl.u32 %v45_v14, 16  ;;  %v50_v19 = vshrl.u32 %v46_v15, 16 }
  0x1e   :  { %v51_v20 = vxor.u32 %v47_v16, %v43_v12  ;;  %v52_v21 = vxor.u32 %v48_v17, %v44_v13  ;;  %v53_v22 = vxor.u32 %v49_v18, %v45_v14  ;;  %v54_v23 = vxor.u32 %v50_v19, %v46_v15 }
  0x20   :  { %v55_v24 = vmul.u32 2146121005, %v51_v20  ;;  %v56_v25 = vmul.u32 2146121005, %v52_v21 }
  0x21   :  { %v57_v26 = vmul.u32 2146121005, %v53_v22  ;;  %v58_v27 = vmul.u32 2146121005, %v54_v23 }
  0x22   :  { %v59_v28 = vshrl.u32 %v55_v24, 15  ;;  %v60_v29 = vshrl.u32 %v56_v25, 15 }
  0x23   :  { %v61_v30 = vshrl.u32 %v57_v26, 15  ;;  %v62_v31 = vshrl.u32 %v58_v27, 15 }
  0x24   :  { %v63_v32 = vxor.u32 %v59_v28, %v55_v24  ;;  %v64_v33 = vxor.u32 %v60_v29, %v56_v25 }
  0x25   :  { %v65_v34 = vxor.u32 %v61_v30, %v57_v26  ;;  %v66_v35 = vxor.u32 %v62_v31, %v58_v27 }
  0x26   :  { %v67_v36 = vmul.u32 2221713035, %v63_v32  ;;  %v68_v38 = vmul.u32 2221713035, %v64_v33 }
  0x27   :  { %v69_v40 = vmul.u32 2221713035, %v65_v34  ;;  %v70_v42 = vmul.u32 2221713035, %v66_v35 }
  0x28   :  { %v71_v44 = vshrl.u32 %v67_v36, 16  ;;  %v72_v45 = vshrl.u32 %v68_v38, 16 }
  0x29   :  { %v73_v48 = vshrl.u32 %v69_v40, 16  ;;  %v74_v49 = vshrl.u32 %v70_v42, 16 }
  0x2a   :  { %v75_v50 = vxor.u32 %v71_v44, %v67_v36  ;;  %v76_v51 = vxor.u32 %v72_v45, %v68_v38 }
  0x2b   :  { %v77_v54 = vxor.u32 %v73_v48, %v69_v40  ;;  %v78_v55 = vxor.u32 %v74_v49, %v70_v42 }
  0x2c   :  { %vm79_vm0 = vcmp.ge.u32.totalorder %v75_v50, 858993459  ;;  %vm80_vm1 = vcmp.ge.u32.totalorder %v76_v51, 858993459 }
  0x2d   :  { %v91_v56 = vsel %vm79_vm0, %v87_v46, 0.0  ;;  %v92_v57 = vsel %vm80_vm1, %v88_v47, 0.0  ;;  %vm81_vm2 = vcmp.ge.u32.totalorder %v77_v54, 858993459  ;;  %vm82_vm3 = vcmp.ge.u32.totalorder %v78_v55, 858993459 }
  0x2e   :  { %95 = vst [vmem:[#allocation6] sm:$0xff] %v91_v56  ;;  %96 = vst [vmem:[#allocation6 + $0x8] sm:$0xff] %v92_v57  ;;  %v93_v58 = vsel %vm81_vm2, %v89_v52, 0.0  ;;  %v94_v59 = vsel %vm82_vm3, %v90_v53, 0.0 }
  0x2f   :  { %97 = vst [vmem:[#allocation6 + $0x10] sm:$0xff] %v93_v58  ;;  %98 = vst [vmem:[#allocation6 + $0x18] sm:$0xff] %v94_v59 }
  0x30   :  { %149 = shalt.err (!%p146_p12)
}
  0x31   :  { %s150_s27 = scalar_lea.hbm %s210_s2, 512 }
  0x32   :  { %p151_p13 = scmp.ne.s32.totalorder %s210_s2, %s150_s27  ;;  %p154_p0 = scmp.lt.u32.totalorder %s150_s27, %s210_s2 }
  0x34   :  { %p156_p1 = pnand %p154_p0, %p151_p13 }
  0x36   :  { %159 = shalt.err (!%p156_p1)
}
  0x37   :  { %108 = dma.vmem_to_hbm [thread:$0]  %s106_s1, 512, %s210_s2, [#allocation5]  }
  0x38   :  { %162 = dma.done.wait [#allocation5], 512  }
  0x39   :  { %163 = vsyncadd [#allocation5], 4294966784 }
  0x3a   :  { %112 = vsyncpa [#allocation4], 1 }
  0x3b   :  { %113 = vsyncpa [#allocation5], 1 }

</bundles_post_ra>
